<compile_context>
chip_gen: v7x
topology: tpu7x:2x2x1
jax: 0.10.0
libtpu: 0.0.40
codegen_flags: <defaults>
</compile_context>

<pallas_src>
import jax
import jax.numpy as jnp
from jax.experimental import pallas as pl
from jax.experimental.pallas import tpu as pltpu


def _make_emoshift_kernel(tq, unroll):
    def kernel(qp_ref, kp_ref, w2_ref, b2_ref, out_ref):
        """One grid step: one batch element, a (TQ x TK) tile of (query, key) pairs.

        qp_ref  : (TQ, H)      query-side fc projection (b1 already folded in)
        kp_ref  : (TK, H)      key-side fc projection
        w2_ref  : (2, H)       classify weight, transposed
        b2_ref  : (2,)         classify bias (SMEM scalars)
        out_ref : (2, TQ, TK)  logits tile, class-major
        """
        k_tile = kp_ref[...]          # (TK, H)  -- hoisted out of the row loop
        w2 = w2_ref[...]              # (2, H)   -- hoisted
        b2_0 = b2_ref[0]
        b2_1 = b2_ref[1]

        def row_body(r, carry):
            q_row = qp_ref[r, :]                                    # (H,)
            # ReLU(q_i + k_j) slab for this single query row: (TK, H).
            # Sublane broadcast of q_row; the full (TQ, TK, H) intermediate is
            # never materialized, so nothing spills.
            slab = jnp.maximum(q_row + k_tile, 0.0)
            # H-contraction on the MXU (NT matmul): (2,H) x (TK,H)^T -> (2,TK),
            # lane-dense on TK, no XLU cross-lane reduce / relayout.
            res = jax.lax.dot_general(
                w2, slab,
                dimension_numbers=(((1,), (1,)), ((), ())),
                preferred_element_type=jnp.float32,
                precision=jax.lax.Precision.HIGHEST)                # (2, TK)
            out_ref[0, r, :] = res[0] + b2_0
            out_ref[1, r, :] = res[1] + b2_1
            return carry

        jax.lax.fori_loop(0, tq, row_body, 0, unroll=unroll)

    return kernel


def emoshift_forward(embeds, umask, qmask, w1, b1, w2, b2, embeds_cmp=None,
                     *, tq=None, tk=None):
    """Pallas implementation of EmoShift.forward (eval mode).

    embeds : (S, B, D) float32
    w1     : (2D, H), b1: (H,), w2: (H, 2), b2: (2,)   [x @ W layout]
    umask / qmask: unused by the reference forward (API parity only).
    returns: (S, S, B, 2) float32 logits
    """
    del umask, qmask  # unused in the original forward pass
    keys = embeds if embeds_cmp is None else embeds_cmp

    S, B, D = embeds.shape
    H = w1.shape[1]
    assert w1.shape == (2 * D, H)

    # One-time fc half-projections (linearity of Linear over the concat).
    # O(S*B*D*H): small next to the O(S^2) kernel, keep HIGHEST for accuracy.
    hp = jax.lax.Precision.HIGHEST
    w1_q, w1_k = w1[:D], w1[D:]
    q_proj = jnp.einsum("sbd,dh->bsh", embeds, w1_q, precision=hp) + b1  # (B,S,H)
    k_proj = jnp.einsum("sbd,dh->bsh", keys, w1_k, precision=hp)         # (B,S,H)
    w2_t = w2.T.astype(jnp.float32)                                      # (2, H)
    b2 = b2.astype(jnp.float32)

    # Tile sizes: TQ = sublane dim, TK = lane dim of the output tile.  Large
    # tiles amortize per-grid-step overhead; per-step VMEM is tiny (~0.5 MiB at
    # TQ=TK=H=128) because batch lives on the grid, not in the block.
    tq = (min(128, S) if tq is None else tq)
    tk = (min(128, S) if tk is None else tk)
    assert S % tq == 0 and S % tk == 0, "S must be divisible by the tile sizes"
    # TODO(synk): sequence lengths not divisible by the tiles need padded /
    # masked edge tiles; not required for this test shape.
    unroll = tq if tq <= 16 else 8   # full unroll only for short row loops

    grid = (B, S // tq, S // tk)

    out = pl.pallas_call(
        _make_emoshift_kernel(tq, unroll),
        out_shape=jax.ShapeDtypeStruct((2, B, S, S), jnp.float32),
        grid_spec=pltpu.PrefetchScalarGridSpec(
            num_scalar_prefetch=0,
            grid=grid,
            in_specs=[
                pl.BlockSpec((None, tq, H), lambda b, i, j: (b, i, 0)),   # q tile
                pl.BlockSpec((None, tk, H), lambda b, i, j: (b, j, 0)),   # k tile
                pl.BlockSpec((2, H), lambda b, i, j: (0, 0)),             # W2^T
                pl.BlockSpec(memory_space=pltpu.MemorySpace.SMEM),        # b2
            ],
            out_specs=pl.BlockSpec((2, None, tq, tk),
                                   lambda b, i, j: (0, b, i, j)),
        ),
        compiler_params=pltpu.CompilerParams(
            dimension_semantics=("parallel", "parallel", "parallel"),
            vmem_limit_bytes=32 * 1024 * 1024),
    )(q_proj, k_proj, w2_t, b2)

    # (2, B, S, S) -> (S, S, B, 2): pure layout plumbing in the wrapper.
    return jnp.transpose(out, (2, 3, 1, 0))


def emoshift_reference(embeds, w1, b1, w2, b2, embeds_cmp=None):
    """Plain-JAX reference mirroring the PyTorch forward (eval mode)."""
    keys = embeds if embeds_cmp is None else embeds_cmp
    S = embeds.shape[0]
    hp = jax.lax.Precision.HIGHEST
    q = jnp.repeat(embeds[:, None], S, axis=1)   # (S, S, B, D)
    k = jnp.repeat(keys[None, :], S, axis=0)     # (S, S, B, D)
    diff = jnp.concatenate([q, k], axis=-1)      # (S, S, B, 2D)
    h = jnp.maximum(jnp.einsum("ijbd,dh->ijbh", diff, w1, precision=hp) + b1, 0.0)
    return jnp.einsum("ijbh,hc->ijbc", h, w2, precision=hp) + b2


if __name__ == "__main__":
    # Small, deterministic problem: seq=8, batch=2, d_model=32, output_dim=128.
    S, B, D, H = 8, 2, 32, 128

    key = jax.random.PRNGKey(0)
    k_x, k_w1, k_b1, k_w2, k_b2 = jax.random.split(key, 5)

    embeds = jax.random.normal(k_x, (S, B, D), dtype=jnp.float32)
    umask = jnp.ones((B, S), dtype=jnp.float32)   # unused by forward
    qmask = jnp.zeros((S, B), dtype=jnp.float32)  # unused by forward

    # Parameters (torch Linear stores (out,in); we store the transposed x@W form).
    w1 = jax.random.normal(k_w1, (2 * D, H), dtype=jnp.float32) * 0.05
    b1 = jax.random.normal(k_b1, (H,), dtype=jnp.float32) * 0.05
    w2 = jax.random.normal(k_w2, (H, 2), dtype=jnp.float32) * 0.05
    b2 = jax.random.normal(k_b2, (2,), dtype=jnp.float32) * 0.05

    logits = emoshift_forward(embeds, umask, qmask, w1, b1, w2, b2)
    logits = jax.block_until_ready(logits)

    ref = emoshift_reference(embeds, w1, b1, w2, b2)
    assert logits.shape == (S, S, B, 2), logits.shape
    assert jnp.allclose(logits, ref, rtol=1e-4, atol=1e-4), (
        "mismatch vs reference")

    print("KERNEL_OK")
</pallas_src>

<mosaic_0001>
module attributes {stable_mosaic.version = 11 : i64} {
  func.func @kernel(%arg0: i32, %arg1: i32, %arg2: i32, %arg3: memref<1x8x128xf32, #tpu.memory_space<vmem>>, %arg4: memref<1x8x128xf32, #tpu.memory_space<vmem>>, %arg5: memref<2x128xf32, #tpu.memory_space<vmem>>, %arg6: memref<2xf32, #tpu.memory_space<smem>>, %arg7: memref<2x1x8x8xf32, #tpu.memory_space<vmem>>) attributes {dimension_semantics = [#tpu.dimension_semantics<parallel>, #tpu.dimension_semantics<parallel>, #tpu.dimension_semantics<parallel>], iteration_bounds = array<i64: 2, 1, 1>, scalar_prefetch = 0 : i64, scratch_operands = 0 : i64, tpu.core_type = #tpu.core_type<tc>, window_params = [{transform_indices = @transform_0, window_bounds = array<i64: 1, 8, 128>}, {transform_indices = @transform_1, window_bounds = array<i64: 1, 8, 128>}, {pipeline_mode = #tpu.pipeline_mode<synchronous>, transform_indices = @transform_2, window_bounds = array<i64: 2, 128>}, {transform_indices = @transform_3, window_bounds = array<i64: 2>}, {transform_indices = @transform_4, window_bounds = array<i64: 2, 1, 8, 8>}]} {
    %c0 = arith.constant 0 : index
    %c0_0 = arith.constant 0 : index
    %c0_1 = arith.constant 0 : index
    %0 = vector.load %arg4[%c0, %c0_0, %c0_1] : memref<1x8x128xf32, #tpu.memory_space<vmem>>, vector<1x8x128xf32>
    %1 = vector.shape_cast %0 : vector<1x8x128xf32> to vector<8x128xf32>
    %c0_2 = arith.constant 0 : index
    %c0_3 = arith.constant 0 : index
    %2 = vector.load %arg5[%c0_2, %c0_3] : memref<2x128xf32, #tpu.memory_space<vmem>>, vector<2x128xf32>
    %c0_4 = arith.constant 0 : index
    %3 = memref.load %arg6[%c0_4] : memref<2xf32, #tpu.memory_space<smem>>
    %c1 = arith.constant 1 : index
    %4 = memref.load %arg6[%c1] : memref<2xf32, #tpu.memory_space<smem>>
    %c0_i32 = arith.constant 0 : i32
    %c0_5 = arith.constant 0 : index
    %5 = arith.index_cast %c0_i32 : i32 to index
    %c0_6 = arith.constant 0 : index
    %6 = vector.load %arg3[%c0_5, %5, %c0_6] : memref<1x8x128xf32, #tpu.memory_space<vmem>>, vector<1x1x128xf32>
    %7 = vector.shape_cast %6 : vector<1x1x128xf32> to vector<128xf32>
    %8 = vector.shape_cast %7 : vector<128xf32> to vector<1x128xf32>
    %9 = vector.broadcast %8 : vector<1x128xf32> to vector<8x128xf32>
    %10 = arith.addf %9, %1 : vector<8x128xf32>
    %cst = arith.constant 0.000000e+00 : f32
    %11 = vector.broadcast %cst : f32 to vector<8x128xf32>
    %12 = arith.maximumf %10, %11 : vector<8x128xf32>
    %cst_7 = arith.constant dense<0.000000e+00> : vector<2x8xf32>
    %13 = tpu.matmul %2, %12, %cst_7 {dimension_numbers = #tpu.dot_dimension_numbers<[1], [1], [0], [0], [0, 0, 1, 0], [], []>, precision = #tpu.contract_precision<fp32>} : vector<2x128xf32>, vector<8x128xf32>, vector<2x8xf32> -> vector<2x8xf32>
    %14 = vector.extract_strided_slice %13 {offsets = [0, 0], sizes = [1, 8], strides = [1, 1]} : vector<2x8xf32> to vector<1x8xf32>
    %15 = vector.shape_cast %14 : vector<1x8xf32> to vector<8xf32>
    %16 = vector.broadcast %3 : f32 to vector<8xf32>
    %17 = arith.addf %15, %16 : vector<8xf32>
    %c0_8 = arith.constant 0 : index
    %c0_9 = arith.constant 0 : index
    %18 = arith.index_cast %c0_i32 : i32 to index
    %c0_10 = arith.constant 0 : index
    %19 = vector.load %arg7[%c0_8, %c0_9, %18, %c0_10] : memref<2x1x8x8xf32, #tpu.memory_space<vmem>>, vector<1x1x1x8xf32>
    %20 = vector.shape_cast %19 : vector<1x1x1x8xf32> to vector<8xf32>
    %21 = vector.shape_cast %17 : vector<8xf32> to vector<1x1x1x8xf32>
    tpu.vector_store %arg7[%c0_8, %c0_9, %18, %c0_10], %21 {strides = array<i32>} : memref<2x1x8x8xf32, #tpu.memory_space<vmem>>, vector<1x1x1x8xf32>,
    %22 = vector.extract_strided_slice %13 {offsets = [1, 0], sizes = [1, 8], strides = [1, 1]} : vector<2x8xf32> to vector<1x8xf32>
    %23 = vector.shape_cast %22 : vector<1x8xf32> to vector<8xf32>
    %24 = vector.broadcast %4 : f32 to vector<8xf32>
    %25 = arith.addf %23, %24 : vector<8xf32>
    %c1_11 = arith.constant 1 : index
    %c0_12 = arith.constant 0 : index
    %26 = arith.index_cast %c0_i32 : i32 to index
    %c0_13 = arith.constant 0 : index
    %27 = vector.load %arg7[%c1_11, %c0_12, %26, %c0_13] : memref<2x1x8x8xf32, #tpu.memory_space<vmem>>, vector<1x1x1x8xf32>
    %28 = vector.shape_cast %27 : vector<1x1x1x8xf32> to vector<8xf32>
    %29 = vector.shape_cast %25 : vector<8xf32> to vector<1x1x1x8xf32>
    tpu.vector_store %arg7[%c1_11, %c0_12, %26, %c0_13], %29 {strides = array<i32>} : memref<2x1x8x8xf32, #tpu.memory_space<vmem>>, vector<1x1x1x8xf32>,
    %c1_i32 = arith.constant 1 : i32
    %c0_14 = arith.constant 0 : index
    %30 = arith.index_cast %c1_i32 : i32 to index
    %c0_15 = arith.constant 0 : index
    %31 = vector.load %arg3[%c0_14, %30, %c0_15] : memref<1x8x128xf32, #tpu.memory_space<vmem>>, vector<1x1x128xf32>
    %32 = vector.shape_cast %31 : vector<1x1x128xf32> to vector<128xf32>
    %33 = vector.shape_cast %32 : vector<128xf32> to vector<1x128xf32>
    %34 = vector.broadcast %33 : vector<1x128xf32> to vector<8x128xf32>
    %35 = arith.addf %34, %1 : vector<8x128xf32>
    %cst_16 = arith.constant 0.000000e+00 : f32
    %36 = vector.broadcast %cst_16 : f32 to vector<8x128xf32>
    %37 = arith.maximumf %35, %36 : vector<8x128xf32>
    %cst_17 = arith.constant dense<0.000000e+00> : vector<2x8xf32>
    %38 = tpu.matmul %2, %37, %cst_17 {dimension_numbers = #tpu.dot_dimension_numbers<[1], [1], [0], [0], [0, 0, 1, 0], [], []>, precision = #tpu.contract_precision<fp32>} : vector<2x128xf32>, vector<8x128xf32>, vector<2x8xf32> -> vector<2x8xf32>
    %39 = vector.extract_strided_slice %38 {offsets = [0, 0], sizes = [1, 8], strides = [1, 1]} : vector<2x8xf32> to vector<1x8xf32>
    %40 = vector.shape_cast %39 : vector<1x8xf32> to vector<8xf32>
    %41 = vector.broadcast %3 : f32 to vector<8xf32>
    %42 = arith.addf %40, %41 : vector<8xf32>
    %c0_18 = arith.constant 0 : index
    %c0_19 = arith.constant 0 : index
    %43 = arith.index_cast %c1_i32 : i32 to index
    %c0_20 = arith.constant 0 : index
    %44 = vector.load %arg7[%c0_18, %c0_19, %43, %c0_20] : memref<2x1x8x8xf32, #tpu.memory_space<vmem>>, vector<1x1x1x8xf32>
    %45 = vector.shape_cast %44 : vector<1x1x1x8xf32> to vector<8xf32>
    %46 = vector.shape_cast %42 : vector<8xf32> to vector<1x1x1x8xf32>
    tpu.vector_store %arg7[%c0_18, %c0_19, %43, %c0_20], %46 {strides = array<i32>} : memref<2x1x8x8xf32, #tpu.memory_space<vmem>>, vector<1x1x1x8xf32>,
    %47 = vector.extract_strided_slice %38 {offsets = [1, 0], sizes = [1, 8], strides = [1, 1]} : vector<2x8xf32> to vector<1x8xf32>
    %48 = vector.shape_cast %47 : vector<1x8xf32> to vector<8xf32>
    %49 = vector.broadcast %4 : f32 to vector<8xf32>
    %50 = arith.addf %48, %49 : vector<8xf32>
    %c1_21 = arith.constant 1 : index
    %c0_22 = arith.constant 0 : index
    %51 = arith.index_cast %c1_i32 : i32 to index
    %c0_23 = arith.constant 0 : index
    %52 = vector.load %arg7[%c1_21, %c0_22, %51, %c0_23] : memref<2x1x8x8xf32, #tpu.memory_space<vmem>>, vector<1x1x1x8xf32>
    %53 = vector.shape_cast %52 : vector<1x1x1x8xf32> to vector<8xf32>
    %54 = vector.shape_cast %50 : vector<8xf32> to vector<1x1x1x8xf32>
    tpu.vector_store %arg7[%c1_21, %c0_22, %51, %c0_23], %54 {strides = array<i32>} : memref<2x1x8x8xf32, #tpu.memory_space<vmem>>, vector<1x1x1x8xf32>,
    %c2_i32 = arith.constant 2 : i32
    %c0_24 = arith.constant 0 : index
    %55 = arith.index_cast %c2_i32 : i32 to index
    %c0_25 = arith.constant 0 : index
    %56 = vector.load %arg3[%c0_24, %55, %c0_25] : memref<1x8x128xf32, #tpu.memory_space<vmem>>, vector<1x1x128xf32>
    %57 = vector.shape_cast %56 : vector<1x1x128xf32> to vector<128xf32>
    %58 = vector.shape_cast %57 : vector<128xf32> to vector<1x128xf32>
    %59 = vector.broadcast %58 : vector<1x128xf32> to vector<8x128xf32>
    %60 = arith.addf %59, %1 : vector<8x128xf32>
    %cst_26 = arith.constant 0.000000e+00 : f32
    %61 = vector.broadcast %cst_26 : f32 to vector<8x128xf32>
    %62 = arith.maximumf %60, %61 : vector<8x128xf32>
    %cst_27 = arith.constant dense<0.000000e+00> : vector<2x8xf32>
    %63 = tpu.matmul %2, %62, %cst_27 {dimension_numbers = #tpu.dot_dimension_numbers<[1], [1], [0], [0], [0, 0, 1, 0], [], []>, precision = #tpu.contract_precision<fp32>} : vector<2x128xf32>, vector<8x128xf32>, vector<2x8xf32> -> vector<2x8xf32>
    %64 = vector.extract_strided_slice %63 {offsets = [0, 0], sizes = [1, 8], strides = [1, 1]} : vector<2x8xf32> to vector<1x8xf32>
    %65 = vector.shape_cast %64 : vector<1x8xf32> to vector<8xf32>
    %66 = vector.broadcast %3 : f32 to vector<8xf32>
    %67 = arith.addf %65, %66 : vector<8xf32>
    %c0_28 = arith.constant 0 : index
    %c0_29 = arith.constant 0 : index
    %68 = arith.index_cast %c2_i32 : i32 to index
    %c0_30 = arith.constant 0 : index
    %69 = vector.load %arg7[%c0_28, %c0_29, %68, %c0_30] : memref<2x1x8x8xf32, #tpu.memory_space<vmem>>, vector<1x1x1x8xf32>
    %70 = vector.shape_cast %69 : vector<1x1x1x8xf32> to vector<8xf32>
    %71 = vector.shape_cast %67 : vector<8xf32> to vector<1x1x1x8xf32>
    tpu.vector_store %arg7[%c0_28, %c0_29, %68, %c0_30], %71 {strides = array<i32>} : memref<2x1x8x8xf32, #tpu.memory_space<vmem>>, vector<1x1x1x8xf32>,
    %72 = vector.extract_strided_slice %63 {offsets = [1, 0], sizes = [1, 8], strides = [1, 1]} : vector<2x8xf32> to vector<1x8xf32>
    %73 = vector.shape_cast %72 : vector<1x8xf32> to vector<8xf32>
    %74 = vector.broadcast %4 : f32 to vector<8xf32>
    %75 = arith.addf %73, %74 : vector<8xf32>
    %c1_31 = arith.constant 1 : index
    %c0_32 = arith.constant 0 : index
    %76 = arith.index_cast %c2_i32 : i32 to index
    %c0_33 = arith.constant 0 : index
    %77 = vector.load %arg7[%c1_31, %c0_32, %76, %c0_33] : memref<2x1x8x8xf32, #tpu.memory_space<vmem>>, vector<1x1x1x8xf32>
    %78 = vector.shape_cast %77 : vector<1x1x1x8xf32> to vector<8xf32>
    %79 = vector.shape_cast %75 : vector<8xf32> to vector<1x1x1x8xf32>
    tpu.vector_store %arg7[%c1_31, %c0_32, %76, %c0_33], %79 {strides = array<i32>} : memref<2x1x8x8xf32, #tpu.memory_space<vmem>>, vector<1x1x1x8xf32>,
    %c3_i32 = arith.constant 3 : i32
    %c0_34 = arith.constant 0 : index
    %80 = arith.index_cast %c3_i32 : i32 to index
    %c0_35 = arith.constant 0 : index
    %81 = vector.load %arg3[%c0_34, %80, %c0_35] : memref<1x8x128xf32, #tpu.memory_space<vmem>>, vector<1x1x128xf32>
    %82 = vector.shape_cast %81 : vector<1x1x128xf32> to vector<128xf32>
    %83 = vector.shape_cast %82 : vector<128xf32> to vector<1x128xf32>
    %84 = vector.broadcast %83 : vector<1x128xf32> to vector<8x128xf32>
    %85 = arith.addf %84, %1 : vector<8x128xf32>
    %cst_36 = arith.constant 0.000000e+00 : f32
    %86 = vector.broadcast %cst_36 : f32 to vector<8x128xf32>
    %87 = arith.maximumf %85, %86 : vector<8x128xf32>
    %cst_37 = arith.constant dense<0.000000e+00> : vector<2x8xf32>
    %88 = tpu.matmul %2, %87, %cst_37 {dimension_numbers = #tpu.dot_dimension_numbers<[1], [1], [0], [0], [0, 0, 1, 0], [], []>, precision = #tpu.contract_precision<fp32>} : vector<2x128xf32>, vector<8x128xf32>, vector<2x8xf32> -> vector<2x8xf32>
    %89 = vector.extract_strided_slice %88 {offsets = [0, 0], sizes = [1, 8], strides = [1, 1]} : vector<2x8xf32> to vector<1x8xf32>
    %90 = vector.shape_cast %89 : vector<1x8xf32> to vector<8xf32>
    %91 = vector.broadcast %3 : f32 to vector<8xf32>
    %92 = arith.addf %90, %91 : vector<8xf32>
    %c0_38 = arith.constant 0 : index
    %c0_39 = arith.constant 0 : index
    %93 = arith.index_cast %c3_i32 : i32 to index
    %c0_40 = arith.constant 0 : index
    %94 = vector.load %arg7[%c0_38, %c0_39, %93, %c0_40] : memref<2x1x8x8xf32, #tpu.memory_space<vmem>>, vector<1x1x1x8xf32>
    %95 = vector.shape_cast %94 : vector<1x1x1x8xf32> to vector<8xf32>
    %96 = vector.shape_cast %92 : vector<8xf32> to vector<1x1x1x8xf32>
    tpu.vector_store %arg7[%c0_38, %c0_39, %93, %c0_40], %96 {strides = array<i32>} : memref<2x1x8x8xf32, #tpu.memory_space<vmem>>, vector<1x1x1x8xf32>,
    %97 = vector.extract_strided_slice %88 {offsets = [1, 0], sizes = [1, 8], strides = [1, 1]} : vector<2x8xf32> to vector<1x8xf32>
    %98 = vector.shape_cast %97 : vector<1x8xf32> to vector<8xf32>
    %99 = vector.broadcast %4 : f32 to vector<8xf32>
    %100 = arith.addf %98, %99 : vector<8xf32>
    %c1_41 = arith.constant 1 : index
    %c0_42 = arith.constant 0 : index
    %101 = arith.index_cast %c3_i32 : i32 to index
    %c0_43 = arith.constant 0 : index
    %102 = vector.load %arg7[%c1_41, %c0_42, %101, %c0_43] : memref<2x1x8x8xf32, #tpu.memory_space<vmem>>, vector<1x1x1x8xf32>
    %103 = vector.shape_cast %102 : vector<1x1x1x8xf32> to vector<8xf32>
    %104 = vector.shape_cast %100 : vector<8xf32> to vector<1x1x1x8xf32>
    tpu.vector_store %arg7[%c1_41, %c0_42, %101, %c0_43], %104 {strides = array<i32>} : memref<2x1x8x8xf32, #tpu.memory_space<vmem>>, vector<1x1x1x8xf32>,
    %c4_i32 = arith.constant 4 : i32
    %c0_44 = arith.constant 0 : index
    %105 = arith.index_cast %c4_i32 : i32 to index
    %c0_45 = arith.constant 0 : index
    %106 = vector.load %arg3[%c0_44, %105, %c0_45] : memref<1x8x128xf32, #tpu.memory_space<vmem>>, vector<1x1x128xf32>
    %107 = vector.shape_cast %106 : vector<1x1x128xf32> to vector<128xf32>
    %108 = vector.shape_cast %107 : vector<128xf32> to vector<1x128xf32>
    %109 = vector.broadcast %108 : vector<1x128xf32> to vector<8x128xf32>
    %110 = arith.addf %109, %1 : vector<8x128xf32>
    %cst_46 = arith.constant 0.000000e+00 : f32
    %111 = vector.broadcast %cst_46 : f32 to vector<8x128xf32>
    %112 = arith.maximumf %110, %111 : vector<8x128xf32>
    %cst_47 = arith.constant dense<0.000000e+00> : vector<2x8xf32>
    %113 = tpu.matmul %2, %112, %cst_47 {dimension_numbers = #tpu.dot_dimension_numbers<[1], [1], [0], [0], [0, 0, 1, 0], [], []>, precision = #tpu.contract_precision<fp32>} : vector<2x128xf32>, vector<8x128xf32>, vector<2x8xf32> -> vector<2x8xf32>
    %114 = vector.extract_strided_slice %113 {offsets = [0, 0], sizes = [1, 8], strides = [1, 1]} : vector<2x8xf32> to vector<1x8xf32>
    %115 = vector.shape_cast %114 : vector<1x8xf32> to vector<8xf32>
    %116 = vector.broadcast %3 : f32 to vector<8xf32>
    %117 = arith.addf %115, %116 : vector<8xf32>
    %c0_48 = arith.constant 0 : index
    %c0_49 = arith.constant 0 : index
    %118 = arith.index_cast %c4_i32 : i32 to index
    %c0_50 = arith.constant 0 : index
    %119 = vector.load %arg7[%c0_48, %c0_49, %118, %c0_50] : memref<2x1x8x8xf32, #tpu.memory_space<vmem>>, vector<1x1x1x8xf32>
    %120 = vector.shape_cast %119 : vector<1x1x1x8xf32> to vector<8xf32>
    %121 = vector.shape_cast %117 : vector<8xf32> to vector<1x1x1x8xf32>
    tpu.vector_store %arg7[%c0_48, %c0_49, %118, %c0_50], %121 {strides = array<i32>} : memref<2x1x8x8xf32, #tpu.memory_space<vmem>>, vector<1x1x1x8xf32>,
    %122 = vector.extract_strided_slice %113 {offsets = [1, 0], sizes = [1, 8], strides = [1, 1]} : vector<2x8xf32> to vector<1x8xf32>
    %123 = vector.shape_cast %122 : vector<1x8xf32> to vector<8xf32>
    %124 = vector.broadcast %4 : f32 to vector<8xf32>
    %125 = arith.addf %123, %124 : vector<8xf32>
    %c1_51 = arith.constant 1 : index
    %c0_52 = arith.constant 0 : index
    %126 = arith.index_cast %c4_i32 : i32 to index
    %c0_53 = arith.constant 0 : index
    %127 = vector.load %arg7[%c1_51, %c0_52, %126, %c0_53] : memref<2x1x8x8xf32, #tpu.memory_space<vmem>>, vector<1x1x1x8xf32>
    %128 = vector.shape_cast %127 : vector<1x1x1x8xf32> to vector<8xf32>
    %129 = vector.shape_cast %125 : vector<8xf32> to vector<1x1x1x8xf32>
    tpu.vector_store %arg7[%c1_51, %c0_52, %126, %c0_53], %129 {strides = array<i32>} : memref<2x1x8x8xf32, #tpu.memory_space<vmem>>, vector<1x1x1x8xf32>,
    %c5_i32 = arith.constant 5 : i32
    %c0_54 = arith.constant 0 : index
    %130 = arith.index_cast %c5_i32 : i32 to index
    %c0_55 = arith.constant 0 : index
    %131 = vector.load %arg3[%c0_54, %130, %c0_55] : memref<1x8x128xf32, #tpu.memory_space<vmem>>, vector<1x1x128xf32>
    %132 = vector.shape_cast %131 : vector<1x1x128xf32> to vector<128xf32>
    %133 = vector.shape_cast %132 : vector<128xf32> to vector<1x128xf32>
    %134 = vector.broadcast %133 : vector<1x128xf32> to vector<8x128xf32>
    %135 = arith.addf %134, %1 : vector<8x128xf32>
    %cst_56 = arith.constant 0.000000e+00 : f32
    %136 = vector.broadcast %cst_56 : f32 to vector<8x128xf32>
    %137 = arith.maximumf %135, %136 : vector<8x128xf32>
    %cst_57 = arith.constant dense<0.000000e+00> : vector<2x8xf32>
    %138 = tpu.matmul %2, %137, %cst_57 {dimension_numbers = #tpu.dot_dimension_numbers<[1], [1], [0], [0], [0, 0, 1, 0], [], []>, precision = #tpu.contract_precision<fp32>} : vector<2x128xf32>, vector<8x128xf32>, vector<2x8xf32> -> vector<2x8xf32>
    %139 = vector.extract_strided_slice %138 {offsets = [0, 0], sizes = [1, 8], strides = [1, 1]} : vector<2x8xf32> to vector<1x8xf32>
    %140 = vector.shape_cast %139 : vector<1x8xf32> to vector<8xf32>
    %141 = vector.broadcast %3 : f32 to vector<8xf32>
    %142 = arith.addf %140, %141 : vector<8xf32>
    %c0_58 = arith.constant 0 : index
    %c0_59 = arith.constant 0 : index
    %143 = arith.index_cast %c5_i32 : i32 to index
    %c0_60 = arith.constant 0 : index
    %144 = vector.load %arg7[%c0_58, %c0_59, %143, %c0_60] : memref<2x1x8x8xf32, #tpu.memory_space<vmem>>, vector<1x1x1x8xf32>
    %145 = vector.shape_cast %144 : vector<1x1x1x8xf32> to vector<8xf32>
    %146 = vector.shape_cast %142 : vector<8xf32> to vector<1x1x1x8xf32>
    tpu.vector_store %arg7[%c0_58, %c0_59, %143, %c0_60], %146 {strides = array<i32>} : memref<2x1x8x8xf32, #tpu.memory_space<vmem>>, vector<1x1x1x8xf32>,
    %147 = vector.extract_strided_slice %138 {offsets = [1, 0], sizes = [1, 8], strides = [1, 1]} : vector<2x8xf32> to vector<1x8xf32>
    %148 = vector.shape_cast %147 : vector<1x8xf32> to vector<8xf32>
    %149 = vector.broadcast %4 : f32 to vector<8xf32>
    %150 = arith.addf %148, %149 : vector<8xf32>
    %c1_61 = arith.constant 1 : index
    %c0_62 = arith.constant 0 : index
    %151 = arith.index_cast %c5_i32 : i32 to index
    %c0_63 = arith.constant 0 : index
    %152 = vector.load %arg7[%c1_61, %c0_62, %151, %c0_63] : memref<2x1x8x8xf32, #tpu.memory_space<vmem>>, vector<1x1x1x8xf32>
    %153 = vector.shape_cast %152 : vector<1x1x1x8xf32> to vector<8xf32>
    %154 = vector.shape_cast %150 : vector<8xf32> to vector<1x1x1x8xf32>
    tpu.vector_store %arg7[%c1_61, %c0_62, %151, %c0_63], %154 {strides = array<i32>} : memref<2x1x8x8xf32, #tpu.memory_space<vmem>>, vector<1x1x1x8xf32>,
    %c6_i32 = arith.constant 6 : i32
    %c0_64 = arith.constant 0 : index
    %155 = arith.index_cast %c6_i32 : i32 to index
    %c0_65 = arith.constant 0 : index
    %156 = vector.load %arg3[%c0_64, %155, %c0_65] : memref<1x8x128xf32, #tpu.memory_space<vmem>>, vector<1x1x128xf32>
    %157 = vector.shape_cast %156 : vector<1x1x128xf32> to vector<128xf32>
    %158 = vector.shape_cast %157 : vector<128xf32> to vector<1x128xf32>
    %159 = vector.broadcast %158 : vector<1x128xf32> to vector<8x128xf32>
    %160 = arith.addf %159, %1 : vector<8x128xf32>
    %cst_66 = arith.constant 0.000000e+00 : f32
    %161 = vector.broadcast %cst_66 : f32 to vector<8x128xf32>
    %162 = arith.maximumf %160, %161 : vector<8x128xf32>
    %cst_67 = arith.constant dense<0.000000e+00> : vector<2x8xf32>
    %163 = tpu.matmul %2, %162, %cst_67 {dimension_numbers = #tpu.dot_dimension_numbers<[1], [1], [0], [0], [0, 0, 1, 0], [], []>, precision = #tpu.contract_precision<fp32>} : vector<2x128xf32>, vector<8x128xf32>, vector<2x8xf32> -> vector<2x8xf32>
    %164 = vector.extract_strided_slice %163 {offsets = [0, 0], sizes = [1, 8], strides = [1, 1]} : vector<2x8xf32> to vector<1x8xf32>
    %165 = vector.shape_cast %164 : vector<1x8xf32> to vector<8xf32>
    %166 = vector.broadcast %3 : f32 to vector<8xf32>
    %167 = arith.addf %165, %166 : vector<8xf32>
    %c0_68 = arith.constant 0 : index
    %c0_69 = arith.constant 0 : index
    %168 = arith.index_cast %c6_i32 : i32 to index
    %c0_70 = arith.constant 0 : index
    %169 = vector.load %arg7[%c0_68, %c0_69, %168, %c0_70] : memref<2x1x8x8xf32, #tpu.memory_space<vmem>>, vector<1x1x1x8xf32>
    %170 = vector.shape_cast %169 : vector<1x1x1x8xf32> to vector<8xf32>
    %171 = vector.shape_cast %167 : vector<8xf32> to vector<1x1x1x8xf32>
    tpu.vector_store %arg7[%c0_68, %c0_69, %168, %c0_70], %171 {strides = array<i32>} : memref<2x1x8x8xf32, #tpu.memory_space<vmem>>, vector<1x1x1x8xf32>,
    %172 = vector.extract_strided_slice %163 {offsets = [1, 0], sizes = [1, 8], strides = [1, 1]} : vector<2x8xf32> to vector<1x8xf32>
    %173 = vector.shape_cast %172 : vector<1x8xf32> to vector<8xf32>
    %174 = vector.broadcast %4 : f32 to vector<8xf32>
    %175 = arith.addf %173, %174 : vector<8xf32>
    %c1_71 = arith.constant 1 : index
    %c0_72 = arith.constant 0 : index
    %176 = arith.index_cast %c6_i32 : i32 to index
    %c0_73 = arith.constant 0 : index
    %177 = vector.load %arg7[%c1_71, %c0_72, %176, %c0_73] : memref<2x1x8x8xf32, #tpu.memory_space<vmem>>, vector<1x1x1x8xf32>
    %178 = vector.shape_cast %177 : vector<1x1x1x8xf32> to vector<8xf32>
    %179 = vector.shape_cast %175 : vector<8xf32> to vector<1x1x1x8xf32>
    tpu.vector_store %arg7[%c1_71, %c0_72, %176, %c0_73], %179 {strides = array<i32>} : memref<2x1x8x8xf32, #tpu.memory_space<vmem>>, vector<1x1x1x8xf32>,
    %c7_i32 = arith.constant 7 : i32
    %c0_74 = arith.constant 0 : index
    %180 = arith.index_cast %c7_i32 : i32 to index
    %c0_75 = arith.constant 0 : index
    %181 = vector.load %arg3[%c0_74, %180, %c0_75] : memref<1x8x128xf32, #tpu.memory_space<vmem>>, vector<1x1x128xf32>
    %182 = vector.shape_cast %181 : vector<1x1x128xf32> to vector<128xf32>
    %183 = vector.shape_cast %182 : vector<128xf32> to vector<1x128xf32>
    %184 = vector.broadcast %183 : vector<1x128xf32> to vector<8x128xf32>
    %185 = arith.addf %184, %1 : vector<8x128xf32>
    %cst_76 = arith.constant 0.000000e+00 : f32
    %186 = vector.broadcast %cst_76 : f32 to vector<8x128xf32>
    %187 = arith.maximumf %185, %186 : vector<8x128xf32>
    %cst_77 = arith.constant dense<0.000000e+00> : vector<2x8xf32>
    %188 = tpu.matmul %2, %187, %cst_77 {dimension_numbers = #tpu.dot_dimension_numbers<[1], [1], [0], [0], [0, 0, 1, 0], [], []>, precision = #tpu.contract_precision<fp32>} : vector<2x128xf32>, vector<8x128xf32>, vector<2x8xf32> -> vector<2x8xf32>
    %189 = vector.extract_strided_slice %188 {offsets = [0, 0], sizes = [1, 8], strides = [1, 1]} : vector<2x8xf32> to vector<1x8xf32>
    %190 = vector.shape_cast %189 : vector<1x8xf32> to vector<8xf32>
    %191 = vector.broadcast %3 : f32 to vector<8xf32>
    %192 = arith.addf %190, %191 : vector<8xf32>
    %c0_78 = arith.constant 0 : index
    %c0_79 = arith.constant 0 : index
    %193 = arith.index_cast %c7_i32 : i32 to index
    %c0_80 = arith.constant 0 : index
    %194 = vector.load %arg7[%c0_78, %c0_79, %193, %c0_80] : memref<2x1x8x8xf32, #tpu.memory_space<vmem>>, vector<1x1x1x8xf32>
    %195 = vector.shape_cast %194 : vector<1x1x1x8xf32> to vector<8xf32>
    %196 = vector.shape_cast %192 : vector<8xf32> to vector<1x1x1x8xf32>
    tpu.vector_store %arg7[%c0_78, %c0_79, %193, %c0_80], %196 {strides = array<i32>} : memref<2x1x8x8xf32, #tpu.memory_space<vmem>>, vector<1x1x1x8xf32>,
    %197 = vector.extract_strided_slice %188 {offsets = [1, 0], sizes = [1, 8], strides = [1, 1]} : vector<2x8xf32> to vector<1x8xf32>
    %198 = vector.shape_cast %197 : vector<1x8xf32> to vector<8xf32>
    %199 = vector.broadcast %4 : f32 to vector<8xf32>
    %200 = arith.addf %198, %199 : vector<8xf32>
    %c1_81 = arith.constant 1 : index
    %c0_82 = arith.constant 0 : index
    %201 = arith.index_cast %c7_i32 : i32 to index
    %c0_83 = arith.constant 0 : index
    %202 = vector.load %arg7[%c1_81, %c0_82, %201, %c0_83] : memref<2x1x8x8xf32, #tpu.memory_space<vmem>>, vector<1x1x1x8xf32>
    %203 = vector.shape_cast %202 : vector<1x1x1x8xf32> to vector<8xf32>
    %204 = vector.shape_cast %200 : vector<8xf32> to vector<1x1x1x8xf32>
    tpu.vector_store %arg7[%c1_81, %c0_82, %201, %c0_83], %204 {strides = array<i32>} : memref<2x1x8x8xf32, #tpu.memory_space<vmem>>, vector<1x1x1x8xf32>,
    %c8_i32 = arith.constant 8 : i32
    return
  }
  func.func @transform_0(%arg0: i32, %arg1: i32, %arg2: i32) -> (i32, i32, i32) {
    %c0_i32 = arith.constant 0 : i32
    %c0_i32_0 = arith.constant 0 : i32
    return %arg0, %arg1, %c0_i32 : i32, i32, i32
  }
  func.func @transform_1(%arg0: i32, %arg1: i32, %arg2: i32) -> (i32, i32, i32) {
    %c0_i32 = arith.constant 0 : i32
    %c0_i32_0 = arith.constant 0 : i32
    return %arg0, %arg2, %c0_i32 : i32, i32, i32
  }
  func.func @transform_2(%arg0: i32, %arg1: i32, %arg2: i32) -> (i32, i32) {
    %c0_i32 = arith.constant 0 : i32
    %c0_i32_0 = arith.constant 0 : i32
    %c0_i32_1 = arith.constant 0 : i32
    return %c0_i32, %c0_i32_0 : i32, i32
  }
  func.func @transform_3(%arg0: i32, %arg1: i32, %arg2: i32) -> i32 {
    %c0_i32 = arith.constant 0 : i32
    %c0_i32_0 = arith.constant 0 : i32
    return %c0_i32 : i32
  }
  func.func @transform_4(%arg0: i32, %arg1: i32, %arg2: i32) -> (i32, i32, i32, i32) {
    %c0_i32 = arith.constant 0 : i32
    %c0_i32_0 = arith.constant 0 : i32
    return %c0_i32, %arg0, %arg1, %arg2 : i32, i32, i32, i32
  }
}

</mosaic_0001>

<bundles_post_ra>
// kernel: tpu_custom_call.1
= control target key start
LH: loop header
LB: loop body
LE: loop exit
PB: predicated region body
PF: predicated region fallthrough
CT: control target
= control target key end

     0   :  { %s5369_s0 = inlined_call_operand.hbm [shape: f32[2,8,128], index: 0, kind: input, shape index: {}]   ;;  %s5370_s1 = inlined_call_operand.hbm [shape: f32[2,8,128], index: 1, kind: input, shape index: {}]   ;;  %s5371_s2 = inlined_call_operand.vmem [shape: f32[2,128], index: 2, kind: input, shape index: {}]   ;;  %s5372_s3 = inlined_call_operand.vmem [shape: f32[2], index: 3, kind: input, shape index: {}]   ;;  %s5373_s4 = inlined_call_operand.hbm [shape: f32[2,2,8,8], index: 4, kind: output, shape index: {}]  }
   0x1   :  { %5381 = sst [smem:[#allocation15_spill]] %s5369_s0 }
   0x2   :  { %5382 = sst [smem:[#allocation16_spill]] %s5372_s3 }
   0x3   :  { %9 = vsyncpa [#allocation3], 0 }
   0x4   :  { %11 = vsyncpa [#allocation3 + $0x1], 0 }
   0x5   :  { %12 = vsyncpa [#allocation7], 0 }
   0x6   :  { %14 = vsyncpa [#allocation7 + $0x1], 0 }
   0x7   :  { %15 = vsyncpa [#allocation5], 0 }
   0x8   :  { %16 = vsyncpa [#allocation4], 0 }
   0x9   :  { %18 = vsyncpa [#allocation4 + $0x1], 0  ;;  %s4831_s15 = smov 0   ;;  %s4833_s16 = smov 0  }
   0xa   :  { %s4835_s17 = smov 0   ;;  %s4837_s18 = smov 0  }
   0xb   :  { %s4839_s19 = smov 0   ;;  %s4841_s20 = smov 0  }
   0xc LB: > { %s4096_s21 = sadd.s32 4294967295, %s4795_s20   ;;  %s4097_s22 = sadd.s32 4294967294, %s4795_s20   ;;  %s4795_s20 = sphi %s4841_s20, %s24_s20   ;;  %s4791_s19 = sphi %s4839_s19, %s5406_s19   ;;  %s4787_s18 = sphi %s4837_s18, %s5405_s18   ;;  %s4783_s17 = sphi %s4835_s17, %s5404_s17   ;;  %s4779_s16 = sphi %s4833_s16, %s5403_s16   ;;  %s4775_s15 = sphi %s4831_s15, %s5402_s15  }
   0xd   : > { %p65_p0 = scmp.ne.s32.totalorder %s4779_s16, %s4775_s15  ;;  %p4865_p1 = scmp.eq.s32.totalorder %s4096_s21, 0 }
   0xe   : > { %p4869_p2 = scmp.eq.s32.totalorder %s4096_s21, 1  ;;  %p169_p3 = scmp.eq.s32.totalorder %s4097_s22, 1 }
   0xf   : > { %s5383_s23 = scalar_select %p4865_p1, 1, 0 }
  0x10   : > { %p4875_p4 = por %p4865_p1, %p65_p0  ;;  %p4098_p5 = scmp.ge.s32.totalorder %s4795_s20, 1 }
  0x11   : > { %p4880_p6 = por %p169_p3, %p65_p0  ;;  %p176_p7 = scmp.lt.s32.totalorder %s4795_s20, 3 }
  0x12   : > { %s5385_s25 = scalar_select %p4875_p4, 1, 0 }
  0x13   : > { %s5386_s26 = scalar_select %p4880_p6, 1, 0 }
  0x14   : > { %s5387_s3 = sld [smem:[#allocation16_spill]]  ;;  %p4888_p8 = pnand %p4098_p5, %p176_p7 }
  0x15   : > { %s43_s6 = sadd.s32 1, %s4791_s19  ;;  %s52_s7 = sadd.s32 1, %s4783_s17 }
  0x16   : > { %s5388_s30 = scalar_select %p4888_p8, 1, 0 }
  0x17   : > { %p4557_p10 = pneg %p4888_p8  ;;  %p45_p12 = scmp.ge.s32.totalorder %s43_s6, 2 }
  0x19   : > { %p4897_p11 = pnand %p4557_p10, %p4865_p1 }
  0x1a   : > { %s192_s29 = sshll.u32 %s5387_s3, 4  ;;  %s193_s29 = int_to_ptr.vmem [resolvable:$true] %s192_s29 }
  0x1b   : > { %s4630_s8 = scalar_lea.vmem %s193_s29, 16  ;;  %p4632_p0 = pneg %p4897_p11 }
  0x1c   : > { %p4631_p13 = scmp.ne.s32.totalorder %s193_s29, %s4630_s8  ;;  %p4638_p7 = scmp.lt.s32.totalorder %s193_s29, %s193_s29 }
  0x1d   : > { %p4639_p6 = scmp.lt.s32.totalorder %s4630_s8, %s4630_s8 }
  0x1e   : > { %p4633_p3 = pnand %p4632_p0, %p4631_p13 }
  0x1f   : > { %p4640_p9 = por %p4639_p6, %p4638_p7 }
  0x20   : > { %p4634_p5 = pneg %p4633_p3 }
  0x22   : > { %p4641_p4 = pnand %p4640_p9, %p4634_p5 }
  0x24   : > { %4644 = shalt.err (!%p4641_p4)
}
  0x25   : > { %s4797_s9 = smov [#allocation8]   ;;  %s5408_s6 = smov (%p45_p12, %s43_s6), 0 }
  0x26   : > { %4560 = dma.vmem_to_smem (!%p4897_p11), %s193_s29, 16, %s4797_s9, [#allocation5]  }
  0x27   : > { %5390 = sst [smem:[#allocation14_spill]] %s5408_s6  ;;  %p59_p10 = scmp.ne.s32.totalorder %s4783_s17, %s4779_s16 }
  0x28   : > { %p60_p6 = scmp.eq.s32.totalorder %s4795_s20, 0  ;;  %s47_s10 = ssub.s32 %s4791_s19, %s5408_s6 }
  0x29   : > { %p4573_p4 = scmp.lt.s32.totalorder %s4795_s20, 2  ;;  %p50_p9 = scmp.eq.s32.totalorder %s47_s10, 0 }
  0x2a   : > { %p61_p13 = por %p60_p6, %p59_p10  ;;  %p4917_p0 = por %p4869_p2, %p59_p10 }
  0x2b   : > { %s4922_s12 = sand.u32 1, %s4783_s17   ;;  %s4102_s21 = sshll.u32 %s4791_s19, 7 }
  0x2c   : > { %s5391_s11 = scalar_select %p4917_p0, 1, 0 }
  0x2d   : > { %s4925_s13 = scalar_select %p50_p9, %s4783_s17, %s52_s7  }
  0x2e   : > { %s5375_s14 = sshll.u32 %s4922_s12, 3  ;;  %s5392_s0 = sld [smem:[#allocation15_spill]] }
  0x2f   : > { %s207_s24 = scalar_lea.vmem [#allocation2], %s5375_s14  ;;  %p4938_p2 = pnand %p4573_p4, %p61_p13 }
  0x30   : > { %s215_s29 = sshll.u32 %s207_s24, 4  ;;  %s4945_s9 = scalar_lea.hbm %s5370_s1, %s4102_s21  ;;  %s4936_s29 = int_to_ptr.vmem [resolvable:$true] %s215_s29 }
  0x31   : > { %s204_s10 = scalar_lea.sflag [#allocation3], %s4922_s12  ;;  %p4647_p12 = pneg %p4938_p2 }
  0x34   : > { %s4932_s28 = scalar_lea.hbm %s5392_s0, %s4102_s21  ;;  %s4650_s14 = scalar_lea.hbm %s5392_s0, 256 }
  0x35   : > { %s4645_s22 = scalar_lea.hbm %s4932_s28, 128  ;;  %p4651_p7 = scmp.lt.u32.totalorder %s4932_s28, %s5392_s0 }
  0x36   : > { %p4646_p11 = scmp.ne.s32.totalorder %s4932_s28, %s4645_s22  ;;  %p4652_p10 = scmp.lt.u32.totalorder %s4650_s14, %s4645_s22 }
  0x37   : > { %p4654_p4 = scmp.lt.u32.totalorder %s4645_s22, %s4932_s28 }
  0x38   : > { %p4648_p3 = pnand %p4647_p12, %p4646_p11  ;;  %p4653_p6 = por %p4652_p10, %p4651_p7 }
  0x3a   : > { %p4649_p5 = pneg %p4648_p3  ;;  %p4655_p9 = por %p4654_p4, %p4653_p6 }
  0x3c   : > { %p4656_p13 = pnand %p4655_p9, %p4649_p5 }
  0x3e   : > { %4659 = shalt.err (!%p4656_p13)
}
  0x3f   : > { %s4660_s21 = scalar_lea.vmem %s4936_s29, 128  ;;  %s4798_s7 = smov [#allocation2]  }
  0x40   : > { %p4661_p11 = scmp.ne.s32.totalorder %s4936_s29, %s4660_s21  ;;  %s4665_s8 = sshll.u32 %s4798_s7, 4  ;;  %s4666_s8 = int_to_ptr.vmem [resolvable:$false] %s4665_s8 }
  0x41   : > { %s4667_s3 = scalar_lea.vmem %s4666_s8, 256  ;;  %p4668_p1 = scmp.lt.s32.totalorder %s4936_s29, %s4666_s8 }
  0x42   : > { %p4663_p3 = pnand %p4661_p11, %p4647_p12  ;;  %p4669_p7 = scmp.lt.s32.totalorder %s4667_s3, %s4660_s21 }
  0x44   : > { %p4664_p0 = pneg %p4663_p3  ;;  %p4670_p10 = por %p4669_p7, %p4668_p1 }
  0x46   : > { %p4671_p6 = pnand %p4670_p10, %p4664_p0 }
  0x48   : > { %4674 = shalt.err (!%p4671_p6)
}
  0x49   : > { %4564 = dma.hbm_to_vmem [thread:$0]  (!%p4938_p2), %s4932_s28, 128, %s4936_s29, %s204_s10  }
  0x4a   : > { %s5394_s6 = sshll.u32 %s4922_s12, 3  ;;  %s223_s27 = scalar_lea.sflag [#allocation7], %s4922_s12 }
  0x4b   : > { %s226_s14 = scalar_lea.vmem [#allocation6], %s5394_s6  ;;  %s4675_s24 = scalar_lea.hbm %s4945_s9, 128 }
  0x4c   : > { %s234_s22 = sshll.u32 %s226_s14, 4  ;;  %p4676_p1 = scmp.ne.s32.totalorder %s4945_s9, %s4675_s24  ;;  %s235_s22 = int_to_ptr.vmem [resolvable:$true] %s234_s22 }
  0x4d   : > { %s4680_s8 = scalar_lea.hbm %s5370_s1, 256  ;;  %p4681_p4 = scmp.lt.u32.totalorder %s4945_s9, %s5370_s1 }
  0x4e   : > { %p4678_p0 = pnand %p4676_p1, %p4647_p12  ;;  %p4682_p9 = scmp.lt.u32.totalorder %s4680_s8, %s4675_s24 }
  0x4f   : > { %p4684_p11 = scmp.lt.u32.totalorder %s4675_s24, %s4945_s9 }
  0x50   : > { %p4679_p5 = pneg %p4678_p0  ;;  %p4683_p13 = por %p4682_p9, %p4681_p4 }
  0x52   : > { %p4685_p3 = por %p4684_p11, %p4683_p13 }
  0x54   : > { %p4686_p7 = pnand %p4685_p3, %p4679_p5 }
  0x56   : > { %4689 = shalt.err (!%p4686_p7)
}
  0x57   : > { %s4690_s12 = scalar_lea.vmem %s235_s22, 128  ;;  %s4799_s28 = smov [#allocation6]  }
  0x58   : > { %p4691_p10 = scmp.ne.s32.totalorder %s235_s22, %s4690_s12  ;;  %s4695_s29 = sshll.u32 %s4799_s28, 4  ;;  %s4696_s29 = int_to_ptr.vmem [resolvable:$false] %s4695_s29 }
  0x59   : > { %s4697_s10 = scalar_lea.vmem %s4696_s29, 256  ;;  %p4698_p0 = scmp.lt.s32.totalorder %s235_s22, %s4696_s29 }
  0x5a   : > { %p4693_p6 = pnand %p4691_p10, %p4647_p12  ;;  %p4699_p8 = scmp.lt.s32.totalorder %s4697_s10, %s4690_s12 }
  0x5c   : > { %p4694_p1 = pneg %p4693_p6  ;;  %p4700_p4 = por %p4699_p8, %p4698_p0 }
  0x5e   : > { %p4701_p9 = pnand %p4700_p4, %p4694_p1 }
  0x60   : > { %4704 = shalt.err (!%p4701_p9)
}
  0x61   : > { %4567 = dma.hbm_to_vmem [thread:$0]  (!%p4938_p2), %s4945_s9, 128, %s235_s22, %s223_s27  }
  0x62   : > { %p5395_p5 = scmp.ne.s32.totalorder %s5388_s30, 0 }
  0x63   : > { %s4998_s0 = sand.u32 (!%p5395_p5), 1, %s4779_s16   ;;  %p5396_p8 = scmp.ne.s32.totalorder (!%p5395_p5), %s5385_s25, 0 }
  0x64   : > { %243 = sbr.rel (%p5395_p5) target bundleno = 530 (0x212), region = 36  ;;  %s4106_s6 = sshll.u32 (!%p5395_p5), %s4998_s0, 3 }
  0x65   : > { %s246_s14 = scalar_lea.sflag (!%p5395_p5), [#allocation3], %s4998_s0  ;;  %s5002_s24 = scalar_lea.vmem (!%p5395_p5), [#allocation2], %s4106_s6 }
  0x6b   : > { %4758 = dma.done.wait (%p5396_p8), %s246_s14, 128  }
  0x6c   : > { %4760 = vsyncadd (%p5396_p8), %s246_s14, 4294967168  ;;  %s255_s5 = scalar_lea.sflag [#allocation7], %s4998_s0  ;;  %s258_s30 = scalar_lea.vmem [#allocation6], %s4106_s6 }
  0x6d   : > { %4762 = dma.done.wait (%p5396_p8), %s255_s5, 128  }
  0x6e   : > { %4764 = vsyncadd (%p5396_p8), %s255_s5, 4294967168  ;;  %p5397_p2 = scmp.ne.s32.totalorder %s5383_s23, 0 }
  0x70   : > { %4766 = dma.done.wait (%p5397_p2), [#allocation5], 16  }
  0x71   : > { %4768 = vsyncadd (%p5397_p2), [#allocation5], 4294967280 }
  0x72   : > { %267 = sfence }
  0x73   : > { %v5017_v0 = vld [vmem:[%s258_s30] sm:$0xff]  ;;  %v4111_v1 = vld [vmem:[%s5002_s24] ss:$0 sm:$0xff]  ;;  %v4113_v2 = vld [vmem:[%s5002_s24 + $0x1] ss:$0 sm:$0xff]  ;;  %v4800_v3 = vmov 0.0  }
  0x74   : > { %4227 = vmatprep.subr.mxu0 %v4800_v3  ;;  %4257 = vmatprep.subr.mxu1 %v4800_v3  ;;  %v302_v4 = vadd.f32 %v4111_v1, %v5017_v0  ;;  %v764_v5 = vadd.f32 %v4113_v2, %v5017_v0  ;;  %v294_v6 = vld [vmem:[%s5371_s2] sm:$0x3]  ;;  %vm4801_vm0 = vmmov 0   ;;  %v4115_v24 = vld [vmem:[%s5002_s24 + $0x2] ss:$0 sm:$0xff]  ;;  %s295_s23 = sld [smem:[#allocation8]] }
  0x75   : > { %4229 = vmatprep.mubr.msk.f32.mxu0 %vm4801_vm0, %v4800_v3  ;;  %4259 = vmatprep.mubr.msk.f32.mxu1 %vm4801_vm0, %v4800_v3  ;;  %v5032_v7 = vand.u32 4294901760, %v294_v6  ;;  %v4117_v25 = vld [vmem:[%s5002_s24 + $0x3] ss:$0 sm:$0xff]  ;;  %v1221_v26 = vadd.f32 %v4115_v24, %v5017_v0  ;;  %v4119_v40 = vld [vmem:[%s5002_s24 + $0x4] ss:$0 sm:$0xff]  ;;  %s4110_s22 = sld [smem:[#allocation8 + $0x1]] }
  0x76   : > { %v303_v8 = vmax.f32 %v302_v4, 0.0  ;;  %v765_v9 = vmax.f32 %v764_v5, 0.0  ;;  %v1678_v27 = vadd.f32 %v4117_v25, %v5017_v0  ;;  %v4121_v41 = vld [vmem:[%s5002_s24 + $0x5] ss:$0 sm:$0xff]  ;;  %v2135_v42 = vadd.f32 %v4119_v40, %v5017_v0  ;;  %v4123_v56 = vld [vmem:[%s5002_s24 + $0x6] ss:$0 sm:$0xff] }
  0x77   : > { %v5035_v10 = vsub.f32 %v294_v6, %v5032_v7  ;;  %v1222_v28 = vmax.f32 %v1221_v26, 0.0  ;;  %v2592_v43 = vadd.f32 %v4121_v41, %v5017_v0  ;;  %v4125_v57 = vld [vmem:[%s5002_s24 + $0x7] ss:$0 sm:$0xff]  ;;  %v3049_v58 = vadd.f32 %v4123_v56, %v5017_v0  ;;  %s4109_s27 = sshll.u32 %s4998_s0, 4  ;;  %s4128_s7 = sshll.u32 %s4787_s18, 7 }
  0x78   : > { %v305_v11 = vand.u32 4294901760, %v303_v8  ;;  %v767_v12 = vand.u32 4294901760, %v765_v9  ;;  %v1679_v29 = vmax.f32 %v1678_v27, 0.0  ;;  %v2136_v44 = vmax.f32 %v2135_v42, 0.0  ;;  %s5279_s21 = scalar_lea.vmem [#allocation9], %s4109_s27  ;;  %s5310_s28 = scalar_lea.hbm %s5373_s4, %s4128_s7 }
  0x79   : > { %v5038_v13 = vand.u32 4294901760, %v5035_v10  ;;  %v5076_v30 = vand.u32 4294901760, %v1222_v28  ;;  %v2593_v45 = vmax.f32 %v2592_v43, 0.0  ;;  %v3506_v59 = vadd.f32 %v4125_v57, %v5017_v0  ;;  %s3973_s8 = sshll.u32 %s5279_s21, 4  ;;  %s3959_s18 = scalar_lea.sflag [#allocation4], %s4998_s0  ;;  %s5312_s8 = int_to_ptr.vmem [resolvable:$true] %s3973_s8 }
  0x7a   : > { %4228 = vmatpush3.xpose.msra.mxu0 %v305_v11  ;;  %v382_v14 = vsub.f32 %v303_v8, %v305_v11  ;;  %4258 = vmatpush3.xpose.msra.mxu1 %v767_v12  ;;  %v844_v15 = vsub.f32 %v765_v9, %v767_v12  ;;  %v5078_v31 = vand.u32 4294901760, %v1679_v29  ;;  %v5138_v46 = vand.u32 4294901760, %v2136_v44  ;;  %s4705_s29 = scalar_lea.vmem %s5312_s8, 256  ;;  %p5398_p13 = scmp.ne.s32.totalorder %s5391_s11, 0 }
  0x7b   : > { %v373_v16 = vsub.f32 %v5035_v10, %v5038_v13  ;;  %4232 = vmatprep.subr.mxu0 %v4800_v3  ;;  %4262 = vmatprep.subr.mxu1 %v4800_v3  ;;  %v1301_v32 = vsub.f32 %v1222_v28, %v5076_v30  ;;  %v5140_v47 = vand.u32 4294901760, %v2593_v45  ;;  %v3050_v60 = vmax.f32 %v3049_v58, 0.0  ;;  %p4706_p12 = scmp.ne.s32.totalorder %s5312_s8, %s4705_s29  ;;  %s4802_s10 = smov [#allocation9]  }
  0x7c   : > { %v383_v17 = vand.u32 4294901760, %v382_v14  ;;  %v845_v18 = vand.u32 4294901760, %v844_v15  ;;  %v1758_v33 = vsub.f32 %v1679_v29, %v5078_v31  ;;  %v2215_v48 = vsub.f32 %v2136_v44, %v5138_v46  ;;  %s4709_s6 = sshll.u32 %s4802_s10, 4  ;;  %s4710_s6 = int_to_ptr.vmem [resolvable:$false] %s4709_s6 }
  0x7d   : > { %v5044_v19 = vand.u32 4294901760, %v373_v16  ;;  %v1302_v34 = vand.u32 4294901760, %v1301_v32  ;;  %v2672_v49 = vsub.f32 %v2593_v45, %v5140_v47  ;;  %v3507_v61 = vmax.f32 %v3506_v59, 0.0  ;;  %p4707_p11 = pnand %p4706_p12, %p5398_p13  ;;  %s4711_s14 = scalar_lea.vmem %s4710_s6, 512 }
  0x7e   : > { %v384_v20 = vsub.f32 %v382_v14, %v383_v17  ;;  %v846_v21 = vsub.f32 %v844_v15, %v845_v18  ;;  %v1759_v35 = vand.u32 4294901760, %v1758_v33  ;;  %v2216_v50 = vand.u32 4294901760, %v2215_v48  ;;  %p4712_p7 = scmp.lt.s32.totalorder %s5312_s8, %s4710_s6  ;;  %p4713_p10 = scmp.lt.s32.totalorder %s4711_s14, %s4705_s29 }
  0x7f   : > { %4230 = vmatmul.mubr.f32.vlgmr.msra.gmra.mrb[0].mxu0 %v5044_v19  ;;  %4260 = vmatmul.mubr.f32.vlgmr.msra.gmra.mrb[0].mxu1 %v5044_v19  ;;  %v1303_v36 = vsub.f32 %v1301_v32, %v1302_v34  ;;  %v2673_v51 = vand.u32 4294901760, %v2672_v49  ;;  %v5202_v62 = vand.u32 4294901760, %v3050_v60  ;;  %v5204_v63 = vand.u32 4294901760, %v3507_v61  ;;  %p4708_p3 = pneg %p4707_p11 }
  0x80   : > { %v385_v22 = vand.u32 4294901760, %v384_v20  ;;  %v847_v23 = vand.u32 4294901760, %v846_v21  ;;  %4234 = vmatprep.mubr.msk.f32.mxu0 %vm4801_vm0, %v4800_v3  ;;  %4264 = vmatprep.mubr.msk.f32.mxu1 %vm4801_vm0, %v4800_v3  ;;  %v1760_v37 = vsub.f32 %v1758_v33, %v1759_v35  ;;  %v2217_v52 = vsub.f32 %v2215_v48, %v2216_v50  ;;  %p4714_p6 = por %p4713_p10, %p4712_p7 }
  0x81   : > { %v1304_v38 = vand.u32 4294901760, %v1303_v36  ;;  %v2674_v53 = vsub.f32 %v2672_v49, %v2673_v51  ;;  %v3129_v0 = vsub.f32 %v3050_v60, %v5202_v62  ;;  %v3586_v1 = vsub.f32 %v3507_v61, %v5204_v63 }
  0x82   : > { %4233 = vmatpush3.xpose.msra.mxu0 %v385_v22  ;;  %4263 = vmatpush3.xpose.msra.mxu1 %v847_v23  ;;  %v1761_v39 = vand.u32 4294901760, %v1760_v37  ;;  %v2218_v54 = vand.u32 4294901760, %v2217_v52  ;;  %vm752_vm1 = vcmask 57344   ;;  %vm757_vm2 = vcmask 58369   ;;  %p4715_p1 = pnand %p4714_p6, %p4708_p3 }
  0x83   : > { %4237 = vmatprep.subr.mxu0 %v4800_v3  ;;  %4267 = vmatprep.subr.mxu1 %v4800_v3  ;;  %v2675_v55 = vand.u32 4294901760, %v2674_v53  ;;  %v3130_v2 = vand.u32 4294901760, %v3129_v0  ;;  %v3587_v4 = vand.u32 4294901760, %v3586_v1 }
  0x85   : > { %v3131_v5 = vsub.f32 %v3129_v0, %v3130_v2  ;;  %v3588_v6 = vsub.f32 %v3586_v1, %v3587_v4 }
  0x87   : > { %4235 = vmatmul.mubr.f32.vlgmr.msra.gmra.mrb[0].mxu0 %v5032_v7  ;;  %4265 = vmatmul.mubr.f32.vlgmr.msra.gmra.mrb[0].mxu1 %v5032_v7  ;;  %v3132_v8 = vand.u32 4294901760, %v3131_v5  ;;  %v3589_v9 = vand.u32 4294901760, %v3588_v6 }
  0x88   : > { %4238 = vmatpush3.xpose.msra.mxu0 %v382_v14  ;;  %4268 = vmatpush3.xpose.msra.mxu1 %v844_v15 }
  0x89   : > { %4239 = vmatprep.mubr.msk.f32.mxu0 %vm4801_vm0, %v4800_v3  ;;  %4269 = vmatprep.mubr.msk.f32.mxu1 %vm4801_vm0, %v4800_v3 }
  0x8a   : > { %4242 = vmatprep.subr.mxu0 %v4800_v3  ;;  %4272 = vmatprep.subr.mxu1 %v4800_v3 }
  0x8f   : > { %4240 = vmatmul.mubr.f32.vlgmr.msra.gmra.mrb[0].mxu0 %v5035_v10  ;;  %4270 = vmatmul.mubr.f32.vlgmr.msra.gmra.mrb[0].mxu1 %v5035_v10 }
  0x90   : > { %4243 = vmatpush3.xpose.msra.mxu0 %v305_v11  ;;  %4273 = vmatpush3.xpose.msra.mxu1 %v767_v12 }
  0x91   : > { %4244 = vmatprep.mubr.msk.f32.mxu0 %vm4801_vm0, %v4800_v3  ;;  %4274 = vmatprep.mubr.msk.f32.mxu1 %vm4801_vm0, %v4800_v3 }
  0x92   : > { %4247 = vmatprep.subr.mxu0 %v4800_v3  ;;  %4277 = vmatprep.subr.mxu1 %v4800_v3 }
  0x97   : > { %4245 = vmatmul.mubr.f32.vlgmr.msra.gmra.mrb[0].mxu0 %v5038_v13  ;;  %4275 = vmatmul.mubr.f32.vlgmr.msra.gmra.mrb[0].mxu1 %v5038_v13 }
  0x98   : > { %4248 = vmatpush3.xpose.msra.mxu0 %v383_v17  ;;  %4278 = vmatpush3.xpose.msra.mxu1 %v845_v18 }
  0x99   : > { %4249 = vmatprep.mubr.msk.f32.mxu0 %vm4801_vm0, %v4800_v3  ;;  %4279 = vmatprep.mubr.msk.f32.mxu1 %vm4801_vm0, %v4800_v3 }
  0x9a   : > { %4252 = vmatprep.subr.mxu0 %v4800_v3  ;;  %4282 = vmatprep.subr.mxu1 %v4800_v3 }
  0x9f   : > { %4250 = vmatmul.mubr.f32.vlgmr.msra.gmra.mrb[0].mxu0 %v5032_v7  ;;  %4280 = vmatmul.mubr.f32.vlgmr.msra.gmra.mrb[0].mxu1 %v5032_v7 }
  0xa0   : > { %4253 = vmatpush3.xpose.msra.mxu0 %v305_v11  ;;  %4283 = vmatpush3.xpose.msra.mxu1 %v767_v12  ;;  %v754_v11 = vstv %s4110_s22 }
  0xa1   : > { %4254 = vmatprep.mubr.msk.f32.mxu0 %vm4801_vm0, %v4800_v3  ;;  %4284 = vmatprep.mubr.msk.f32.mxu1 %vm4801_vm0, %v4800_v3 }
  0xa2   : > { %4287 = vmatprep.subr.mxu0 %v4800_v3  ;;  %4317 = vmatprep.subr.mxu1 %v4800_v3 }
  0xa7   : > { %4255 = vmatmul.mubr.f32.vlgmr.msra.gmra.mrb[0].mxu0 %v5032_v7  ;;  %4285 = vmatmul.mubr.f32.vlgmr.msra.gmra.mrb[0].mxu1 %v5032_v7 }
  0xa8   : > { %4288 = vmatpush3.xpose.msra.mxu0 %v5076_v30  ;;  %4318 = vmatpush3.xpose.msra.mxu1 %v5078_v31 }
  0xa9   : > { %4289 = vmatprep.mubr.msk.f32.mxu0 %vm4801_vm0, %v4800_v3  ;;  %4319 = vmatprep.mubr.msk.f32.mxu1 %vm4801_vm0, %v4800_v3 }
  0xaa   : > { %4292 = vmatprep.subr.mxu0 %v4800_v3  ;;  %4322 = vmatprep.subr.mxu1 %v4800_v3 }
  0xab   : > { %4290 = vmatmul.mubr.f32.vlgmr.msra.gmra.mrb[2].mxu0 %v5044_v19  ;;  %4320 = vmatmul.mubr.f32.vlgmr.msra.gmra.mrb[2].mxu1 %v5044_v19 }
  0xac   : > { %4293 = vmatpush3.xpose.msra.mxu0 %v1304_v38  ;;  %4323 = vmatpush3.xpose.msra.mxu1 %v1761_v39 }
  0xad   : > { %4294 = vmatprep.mubr.msk.f32.mxu0 %vm4801_vm0, %v4800_v3  ;;  %4324 = vmatprep.mubr.msk.f32.mxu1 %vm4801_vm0, %v4800_v3 }
  0xae   : > { %4297 = vmatprep.subr.mxu0 %v4800_v3  ;;  %4327 = vmatprep.subr.mxu1 %v4800_v3 }
  0xb3   : > { %4295 = vmatmul.mubr.f32.vlgmr.msra.gmra.mrb[2].mxu0 %v5032_v7  ;;  %4325 = vmatmul.mubr.f32.vlgmr.msra.gmra.mrb[2].mxu1 %v5032_v7 }
  0xb4   : > { %4298 = vmatpush3.xpose.msra.mxu0 %v1301_v32  ;;  %4328 = vmatpush3.xpose.msra.mxu1 %v1758_v33 }
  0xb5   : > { %4299 = vmatprep.mubr.msk.f32.mxu0 %vm4801_vm0, %v4800_v3  ;;  %4329 = vmatprep.mubr.msk.f32.mxu1 %vm4801_vm0, %v4800_v3 }
  0xb6   : > { %4302 = vmatprep.subr.mxu0 %v4800_v3  ;;  %4332 = vmatprep.subr.mxu1 %v4800_v3 }
  0xbb   : > { %4300 = vmatmul.mubr.f32.vlgmr.msra.gmra.mrb[2].mxu0 %v5035_v10  ;;  %4330 = vmatmul.mubr.f32.vlgmr.msra.gmra.mrb[2].mxu1 %v5035_v10 }
  0xbc   : > { %4303 = vmatpush3.xpose.msra.mxu0 %v5076_v30  ;;  %4333 = vmatpush3.xpose.msra.mxu1 %v5078_v31 }
  0xbd   : > { %4304 = vmatprep.mubr.msk.f32.mxu0 %vm4801_vm0, %v4800_v3  ;;  %4334 = vmatprep.mubr.msk.f32.mxu1 %vm4801_vm0, %v4800_v3 }
  0xbe   : > { %4307 = vmatprep.subr.mxu0 %v4800_v3  ;;  %4337 = vmatprep.subr.mxu1 %v4800_v3 }
  0xc3   : > { %4305 = vmatmul.mubr.f32.vlgmr.msra.gmra.mrb[2].mxu0 %v5038_v13  ;;  %4335 = vmatmul.mubr.f32.vlgmr.msra.gmra.mrb[2].mxu1 %v5038_v13 }
  0xc4   : > { %4308 = vmatpush3.xpose.msra.mxu0 %v1302_v34  ;;  %4338 = vmatpush3.xpose.msra.mxu1 %v1759_v35 }
  0xc5   : > { %4309 = vmatprep.mubr.msk.f32.mxu0 %vm4801_vm0, %v4800_v3  ;;  %4339 = vmatprep.mubr.msk.f32.mxu1 %vm4801_vm0, %v4800_v3 }
  0xc6   : > { %4312 = vmatprep.subr.mxu0 %v4800_v3  ;;  %4342 = vmatprep.subr.mxu1 %v4800_v3 }
  0xcb   : > { %4310 = vmatmul.mubr.f32.vlgmr.msra.gmra.mrb[2].mxu0 %v5032_v7  ;;  %4340 = vmatmul.mubr.f32.vlgmr.msra.gmra.mrb[2].mxu1 %v5032_v7 }
  0xcc   : > { %4313 = vmatpush3.xpose.msra.mxu0 %v5076_v30  ;;  %4343 = vmatpush3.xpose.msra.mxu1 %v5078_v31 }
  0xcd   : > { %4314 = vmatprep.mubr.msk.f32.mxu0 %vm4801_vm0, %v4800_v3  ;;  %4344 = vmatprep.mubr.msk.f32.mxu1 %vm4801_vm0, %v4800_v3 }
  0xce   : > { %4347 = vmatprep.subr.mxu0 %v4800_v3  ;;  %4377 = vmatprep.subr.mxu1 %v4800_v3 }
  0xd3   : > { %4315 = vmatmul.mubr.f32.vlgmr.msra.gmra.mrb[2].mxu0 %v5032_v7  ;;  %4345 = vmatmul.mubr.f32.vlgmr.msra.gmra.mrb[2].mxu1 %v5032_v7 }
  0xd4   : > { %4348 = vmatpush3.xpose.msra.mxu0 %v5138_v46  ;;  %4378 = vmatpush3.xpose.msra.mxu1 %v5140_v47 }
  0xd5   : > { %4349 = vmatprep.mubr.msk.f32.mxu0 %vm4801_vm0, %v4800_v3  ;;  %4379 = vmatprep.mubr.msk.f32.mxu1 %vm4801_vm0, %v4800_v3 }
  0xd6   : > { %4352 = vmatprep.subr.mxu0 %v4800_v3  ;;  %4382 = vmatprep.subr.mxu1 %v4800_v3 }
  0xd7   : > { %4350 = vmatmul.mubr.f32.vlgmr.msra.gmra.mrb[4].mxu0 %v5044_v19  ;;  %4380 = vmatmul.mubr.f32.vlgmr.msra.gmra.mrb[4].mxu1 %v5044_v19 }
  0xd8   : > { %4353 = vmatpush3.xpose.msra.mxu0 %v2218_v54  ;;  %4383 = vmatpush3.xpose.msra.mxu1 %v2675_v55 }
  0xd9   : > { %4354 = vmatprep.mubr.msk.f32.mxu0 %vm4801_vm0, %v4800_v3  ;;  %4384 = vmatprep.mubr.msk.f32.mxu1 %vm4801_vm0, %v4800_v3 }
  0xda   : > { %4357 = vmatprep.subr.mxu0 %v4800_v3  ;;  %4387 = vmatprep.subr.mxu1 %v4800_v3 }
  0xdf   : > { %4355 = vmatmul.mubr.f32.vlgmr.msra.gmra.mrb[4].mxu0 %v5032_v7  ;;  %4385 = vmatmul.mubr.f32.vlgmr.msra.gmra.mrb[4].mxu1 %v5032_v7 }
  0xe0   : > { %4358 = vmatpush3.xpose.msra.mxu0 %v2215_v48  ;;  %4388 = vmatpush3.xpose.msra.mxu1 %v2672_v49 }
  0xe1   : > { %4359 = vmatprep.mubr.msk.f32.mxu0 %vm4801_vm0, %v4800_v3  ;;  %4389 = vmatprep.mubr.msk.f32.mxu1 %vm4801_vm0, %v4800_v3 }
  0xe2   : > { %4362 = vmatprep.subr.mxu0 %v4800_v3  ;;  %4392 = vmatprep.subr.mxu1 %v4800_v3 }
  0xe7   : > { %4360 = vmatmul.mubr.f32.vlgmr.msra.gmra.mrb[4].mxu0 %v5035_v10  ;;  %4390 = vmatmul.mubr.f32.vlgmr.msra.gmra.mrb[4].mxu1 %v5035_v10 }
  0xe8   : > { %4363 = vmatpush3.xpose.msra.mxu0 %v5138_v46  ;;  %4393 = vmatpush3.xpose.msra.mxu1 %v5140_v47 }
  0xe9   : > { %4364 = vmatprep.mubr.msk.f32.mxu0 %vm4801_vm0, %v4800_v3  ;;  %4394 = vmatprep.mubr.msk.f32.mxu1 %vm4801_vm0, %v4800_v3 }
  0xea   : > { %4367 = vmatprep.subr.mxu0 %v4800_v3  ;;  %4397 = vmatprep.subr.mxu1 %v4800_v3 }
  0xef   : > { %4365 = vmatmul.mubr.f32.vlgmr.msra.gmra.mrb[4].mxu0 %v5038_v13  ;;  %4395 = vmatmul.mubr.f32.vlgmr.msra.gmra.mrb[4].mxu1 %v5038_v13 }
  0xf0   : > { %4368 = vmatpush3.xpose.msra.mxu0 %v2216_v50  ;;  %4398 = vmatpush3.xpose.msra.mxu1 %v2673_v51 }
  0xf1   : > { %4369 = vmatprep.mubr.msk.f32.mxu0 %vm4801_vm0, %v4800_v3  ;;  %4399 = vmatprep.mubr.msk.f32.mxu1 %vm4801_vm0, %v4800_v3 }
  0xf2   : > { %4372 = vmatprep.subr.mxu0 %v4800_v3  ;;  %4402 = vmatprep.subr.mxu1 %v4800_v3 }
  0xf7   : > { %4370 = vmatmul.mubr.f32.vlgmr.msra.gmra.mrb[4].mxu0 %v5032_v7  ;;  %4400 = vmatmul.mubr.f32.vlgmr.msra.gmra.mrb[4].mxu1 %v5032_v7 }
  0xf8   : > { %4373 = vmatpush3.xpose.msra.mxu0 %v5138_v46  ;;  %4403 = vmatpush3.xpose.msra.mxu1 %v5140_v47 }
  0xf9   : > { %4374 = vmatprep.mubr.msk.f32.mxu0 %vm4801_vm0, %v4800_v3  ;;  %4404 = vmatprep.mubr.msk.f32.mxu1 %vm4801_vm0, %v4800_v3 }
  0xfa   : > { %4407 = vmatprep.subr.mxu0 %v4800_v3  ;;  %4437 = vmatprep.subr.mxu1 %v4800_v3 }
  0xff   : > { %4375 = vmatmul.mubr.f32.vlgmr.msra.gmra.mrb[4].mxu0 %v5032_v7  ;;  %4405 = vmatmul.mubr.f32.vlgmr.msra.gmra.mrb[4].mxu1 %v5032_v7 }
 0x100   : > { %4408 = vmatpush3.xpose.msra.mxu0 %v5202_v62  ;;  %4438 = vmatpush3.xpose.msra.mxu1 %v5204_v63 }
 0x101   : > { %4409 = vmatprep.mubr.msk.f32.mxu0 %vm4801_vm0, %v4800_v3  ;;  %4439 = vmatprep.mubr.msk.f32.mxu1 %vm4801_vm0, %v4800_v3 }
 0x102   : > { %4412 = vmatprep.subr.mxu0 %v4800_v3  ;;  %4442 = vmatprep.subr.mxu1 %v4800_v3 }
 0x103   : > { %4410 = vmatmul.mubr.f32.vlgmr.msra.gmra.mrb[6].mxu0 %v5044_v19  ;;  %4440 = vmatmul.mubr.f32.vlgmr.msra.gmra.mrb[6].mxu1 %v5044_v19 }
 0x104   : > { %4413 = vmatpush3.xpose.msra.mxu0 %v3132_v8  ;;  %4443 = vmatpush3.xpose.msra.mxu1 %v3589_v9 }
 0x105   : > { %4414 = vmatprep.mubr.msk.f32.mxu0 %vm4801_vm0, %v4800_v3  ;;  %4444 = vmatprep.mubr.msk.f32.mxu1 %vm4801_vm0, %v4800_v3 }
 0x106   : > { %4417 = vmatprep.subr.mxu0 %v4800_v3  ;;  %4447 = vmatprep.subr.mxu1 %v4800_v3 }
 0x10b   : > { %4415 = vmatmul.mubr.f32.vlgmr.msra.gmra.mrb[6].mxu0 %v5032_v7  ;;  %4445 = vmatmul.mubr.f32.vlgmr.msra.gmra.mrb[6].mxu1 %v5032_v7 }
 0x10c   : > { %4418 = vmatpush3.xpose.msra.mxu0 %v3129_v0  ;;  %4448 = vmatpush3.xpose.msra.mxu1 %v3586_v1 }
 0x10d   : > { %4419 = vmatprep.mubr.msk.f32.mxu0 %vm4801_vm0, %v4800_v3  ;;  %4449 = vmatprep.mubr.msk.f32.mxu1 %vm4801_vm0, %v4800_v3 }
 0x10e   : > { %4422 = vmatprep.subr.mxu0 %v4800_v3  ;;  %4452 = vmatprep.subr.mxu1 %v4800_v3 }
 0x113   : > { %4420 = vmatmul.mubr.f32.vlgmr.msra.gmra.mrb[6].mxu0 %v5035_v10  ;;  %4450 = vmatmul.mubr.f32.vlgmr.msra.gmra.mrb[6].mxu1 %v5035_v10  ;;  %v750_v10 = vstv %s295_s23 }
 0x114   : > { %4423 = vmatpush3.xpose.msra.mxu0 %v5202_v62  ;;  %4453 = vmatpush3.xpose.msra.mxu1 %v5204_v63 }
 0x115   : > { %4424 = vmatprep.mubr.msk.f32.mxu0 %vm4801_vm0, %v4800_v3  ;;  %4454 = vmatprep.mubr.msk.f32.mxu1 %vm4801_vm0, %v4800_v3 }
 0x116   : > { %4427 = vmatprep.subr.mxu0 %v4800_v3  ;;  %4457 = vmatprep.subr.mxu1 %v4800_v3 }
 0x11b   : > { %4425 = vmatmul.mubr.f32.vlgmr.msra.gmra.mrb[6].mxu0 %v5038_v13  ;;  %4455 = vmatmul.mubr.f32.vlgmr.msra.gmra.mrb[6].mxu1 %v5038_v13 }
 0x11c   : > { %4428 = vmatpush3.xpose.msra.mxu0 %v3130_v2  ;;  %4458 = vmatpush3.xpose.msra.mxu1 %v3587_v4 }
 0x11d   : > { %4429 = vmatprep.mubr.msk.f32.mxu0 %vm4801_vm0, %v4800_v3  ;;  %4459 = vmatprep.mubr.msk.f32.mxu1 %vm4801_vm0, %v4800_v3 }
 0x11e   : > { %4432 = vmatprep.subr.mxu0 %v4800_v3  ;;  %4462 = vmatprep.subr.mxu1 %v4800_v3 }
 0x123   : > { %4430 = vmatmul.mubr.f32.vlgmr.msra.gmra.mrb[6].mxu0 %v5032_v7  ;;  %4460 = vmatmul.mubr.f32.vlgmr.msra.gmra.mrb[6].mxu1 %v5032_v7 }
 0x124   : > { %4433 = vmatpush3.xpose.msra.mxu0 %v5202_v62  ;;  %4463 = vmatpush3.xpose.msra.mxu1 %v5204_v63 }
 0x125   : > { %4434 = vmatprep.mubr.msk.f32.mxu0 %vm4801_vm0, %v4800_v3  ;;  %4464 = vmatprep.mubr.msk.f32.mxu1 %vm4801_vm0, %v4800_v3 }
 0x12b   : > { %4435 = vmatmul.mubr.f32.vlgmr.msra.gmra.mrb[6].mxu0 %v5032_v7  ;;  %4465 = vmatmul.mubr.f32.vlgmr.msra.gmra.mrb[6].mxu1 %v5032_v7 }
 0x17a   : > { %v746_v12 = vpop.f32.mrb[0].mxu0  ;;  %v1208_v13 = vpop.f32.mrb[0].mxu1 }
 0x17b   : > { %v751_v14 = vadd.f32 %v750_v10, %v746_v12  ;;  %v755_v15 = vadd.f32 %v754_v11, %v746_v12  ;;  %v1212_v16 = vadd.f32 %v1208_v13, %v750_v10  ;;  %v1214_v17 = vadd.f32 %v1208_v13, %v754_v11  ;;  %v4256_v18 = vpop.f32.mrb[1].mxu0  ;;  %v4286_v19 = vpop.f32.mrb[1].mxu1 }
 0x17d   : > { %753 = vst.msk [vmem:[%s5279_s21] sm:$0x1] %vm752_vm1, %v751_v14  ;;  %1213 = vst.msk [vmem:[%s5279_s21 + $0x1] sm:$0x1] %vm752_vm1, %v1212_v16 }
 0x17e   : > { %4112 = vst.msk [vmem:[%s5279_s21 + $0x7] sm:$0x2] %vm757_vm2, %v755_v15  ;;  %4114 = vst.msk [vmem:[%s5279_s21 + $0x8] sm:$0x2] %vm757_vm2, %v1214_v17 }
 0x1a6   : > { %v1665_v3 = vpop.f32.mrb[2].mxu0  ;;  %v2122_v7 = vpop.f32.mrb[2].mxu1 }
 0x1a7   : > { %v1669_v20 = vadd.f32 %v1665_v3, %v750_v10  ;;  %v1671_v21 = vadd.f32 %v1665_v3, %v754_v11  ;;  %v2126_v22 = vadd.f32 %v2122_v7, %v750_v10  ;;  %v2128_v23 = vadd.f32 %v2122_v7, %v754_v11  ;;  %v4316_v24 = vpop.f32.mrb[3].mxu0  ;;  %v4346_v25 = vpop.f32.mrb[3].mxu1 }
 0x1a9   : > { %1670 = vst.msk [vmem:[%s5279_s21 + $0x2] sm:$0x1] %vm752_vm1, %v1669_v20  ;;  %2127 = vst.msk [vmem:[%s5279_s21 + $0x3] sm:$0x1] %vm752_vm1, %v2126_v22 }
 0x1aa   : > { %4116 = vst.msk [vmem:[%s5279_s21 + $0x9] sm:$0x2] %vm757_vm2, %v1671_v21  ;;  %4118 = vst.msk [vmem:[%s5279_s21 + $0xa] sm:$0x2] %vm757_vm2, %v2128_v23 }
 0x1d2   : > { %v2579_v26 = vpop.f32.mrb[4].mxu0  ;;  %v3036_v27 = vpop.f32.mrb[4].mxu1 }
 0x1d3   : > { %v2583_v28 = vadd.f32 %v2579_v26, %v750_v10  ;;  %v2585_v29 = vadd.f32 %v2579_v26, %v754_v11  ;;  %v3040_v30 = vadd.f32 %v3036_v27, %v750_v10  ;;  %v3042_v31 = vadd.f32 %v3036_v27, %v754_v11  ;;  %v4376_v32 = vpop.f32.mrb[5].mxu0  ;;  %v4406_v33 = vpop.f32.mrb[5].mxu1 }
 0x1d5   : > { %2584 = vst.msk [vmem:[%s5279_s21 + $0x4] sm:$0x1] %vm752_vm1, %v2583_v28  ;;  %3041 = vst.msk [vmem:[%s5279_s21 + $0x5] sm:$0x1] %vm752_vm1, %v3040_v30 }
 0x1d6   : > { %4120 = vst.msk [vmem:[%s5279_s21 + $0xb] sm:$0x2] %vm757_vm2, %v2585_v29  ;;  %4122 = vst.msk [vmem:[%s5279_s21 + $0xc] sm:$0x2] %vm757_vm2, %v3042_v31 }
 0x1fe   : > { %v3493_v34 = vpop.f32.mrb[6].mxu0  ;;  %v3950_v35 = vpop.f32.mrb[6].mxu1 }
 0x1ff   : > { %v3497_v36 = vadd.f32 %v3493_v34, %v750_v10  ;;  %v3499_v37 = vadd.f32 %v3493_v34, %v754_v11  ;;  %v3954_v38 = vadd.f32 %v3950_v35, %v750_v10  ;;  %v3956_v39 = vadd.f32 %v3950_v35, %v754_v11  ;;  %v4436_v40 = vpop.f32.mrb[7].mxu0  ;;  %v4466_v41 = vpop.f32.mrb[7].mxu1 }
 0x201   : > { %3498 = vst.msk [vmem:[%s5279_s21 + $0x6] sm:$0x1] %vm752_vm1, %v3497_v36  ;;  %3955 = vst.msk [vmem:[%s5279_s21 + $0x7] sm:$0x1] %vm752_vm1, %v3954_v38 }
 0x202   : > { %4124 = vst.msk [vmem:[%s5279_s21 + $0xd] sm:$0x2] %vm757_vm2, %v3499_v37  ;;  %4126 = vst.msk [vmem:[%s5279_s21 + $0xe] sm:$0x2] %vm757_vm2, %v3956_v39 }
 0x203   : > { %4718 = shalt.err (!%p4715_p1)
}
 0x204   : > { %s4719_s24 = scalar_lea.hbm %s5310_s28, 256  ;;  %s4723_s25 = scalar_lea.hbm %s5373_s4, 512 }
 0x205   : > { %p4720_p0 = scmp.ne.s32.totalorder %s5310_s28, %s4719_s24  ;;  %p4724_p5 = scmp.lt.u32.totalorder %s5310_s28, %s5373_s4 }
 0x206   : > { %p4725_p8 = scmp.lt.u32.totalorder %s4723_s25, %s4719_s24  ;;  %p4727_p12 = scmp.lt.u32.totalorder %s4719_s24, %s5310_s28 }
 0x207   : > { %p4721_p4 = pnand %p4720_p0, %p5398_p13 }
 0x208   : > { %p4726_p2 = por %p4725_p8, %p4724_p5 }
 0x209   : > { %p4722_p9 = pneg %p4721_p4 }
 0x20a   : > { %p4728_p11 = por %p4727_p12, %p4726_p2 }
 0x20c   : > { %p4729_p3 = pnand %p4728_p11, %p4722_p9 }
 0x20e   : > { %4732 = shalt.err (!%p4729_p3)
}
 0x20f   : > { %s4803_s22 = smov 128   ;;  %s4804_s27 = smov 256  }
 0x210   : > { %s4805_s21 = smov 8  }
 0x211   : > { %4555 = dma.vmem_to_hbm [thread:$0]  (%p5398_p13), %s5312_s8, 256, %s5310_s28, %s3959_s18, %s4803_s22, %s4804_s27, %s4805_s21  }
 0x212 PF: > { %s3988_s7 = sand.u32 1, %s4775_s15   ;;  %p5399_p7 = scmp.ne.s32.totalorder %s5386_s26, 0 }
 0x213   : > { %p5400_p10 = scmp.ge.s32.totalorder %s4795_s20, 2  ;;  %s3989_s3 = scalar_lea.sflag [#allocation4], %s3988_s7 }
 0x215   : > { %p4569_p6 = pnand %p5400_p10, %p5399_p7 }
 0x217   : > { %4770 = dma.done.wait (!%p4569_p6), %s3989_s3, 256  }
 0x218   : > { %4772 = vsyncadd (!%p4569_p6), %s3989_s3, 4294967040  ;;  %s24_s20 = sadd.s32 1, %s4795_s20   ;;  %s5401_s11 = sld [smem:[#allocation14_spill]] }
 0x219   : > { %p21_p1 = scmp.ge.s32.totalorder %s24_s20, 4   ;;  %s5402_s15 = smov %s4779_s16 }
 0x21a   : > { %s5403_s16 = smov %s4783_s17  ;;  %s5404_s17 = smov %s4925_s13 }
 0x21b   : > { %s5405_s18 = smov %s4791_s19  ;;  %23 = sbr.rel (!%p21_p1) target bundleno = 12 (0xc), region = 100 }
 0x21e   : > { %s5406_s19 = smov %s5401_s11 }
 0x222   :  { %3994 = vsyncpa [#allocation3], 1 }
 0x223   :  { %3996 = vsyncpa [#allocation3 + $0x1], 1 }
 0x224   :  { %3997 = vsyncpa [#allocation7], 1 }
 0x225   :  { %3999 = vsyncpa [#allocation7 + $0x1], 1 }
 0x226   :  { %4000 = vsyncpa [#allocation4], 1 }
 0x227   :  { %4002 = vsyncpa [#allocation4 + $0x1], 1 }
 0x228   :  { %4003 = vsyncpa [#allocation5], 1 }
 0x229   :  { %4005 = vsyncpa [#allocation5 + $0x1], 1 }

</bundles_post_ra>
